<compile_context>
chip_gen: v6e
topology: v6e:2x2x1
jax: 0.10.0
libtpu: 0.0.40
codegen_flags: <defaults>
</compile_context>

<pallas_src>
import functools

import jax
import jax.numpy as jnp
from jax import lax
from jax.experimental import pallas as pl
from jax.experimental.pallas import tpu as pltpu


def _round_up(v, m):
    return -(-v // m) * m


def _classifier_kernel(x_ref, w1_ref, b1_ref, w2_ref, b2_ref, o_ref, *,
                       chunk, precision):
    # Resident parameters (constant index maps -> DMA'd once, stay in VMEM).
    w1 = w1_ref[...]          # (H, F)   fc1.weight, PyTorch layout
    b1 = b1_ref[...]          # (H, 1)   fc1.bias as a column
    w2 = w2_ref[...]          # (H, 1)   fc2.weight as a column
    b2 = b2_ref[0, 0]         # scalar   fc2.bias, read from SMEM

    tm = x_ref.shape[0]
    n_chunks = tm // chunk    # static; small (<= 8 with defaults)

    # Static inner loop over lane-chunks of the big batch tile: keeps vreg
    # pressure low while the grid step stays large. Each iteration ends with a
    # store, so live ranges die at every chunk boundary.
    for c in range(n_chunks):
        start = c * chunk                                   # static offset
        x = x_ref[pl.ds(start, chunk), :]                   # (chunk, F)

        # fc1 on the MXU, batch-on-lanes:
        #   (H, F) . (chunk, F) contracted over F -> (H, chunk), f32 accumulate.
        h = lax.dot_general(
            w1, x,
            dimension_numbers=(((1,), (1,)), ((), ())),
            preferred_element_type=jnp.float32,
            precision=precision,
        )

        # bias + relu in f32 on the VPU; b1 (H, 1) broadcasts across lanes.
        h = jnp.maximum(h + b1, 0.0)

        # fc2 (output width 1) as VPU multiply + sublane (XLU) reduction:
        #   (H, chunk) * (H, 1) summed over H -> (1, chunk), lane-dense.
        y = jnp.sum(h * w2, axis=0, keepdims=True) + b2

        # Lane-dense store into the (1, tm) output tile.
        o_ref[:, pl.ds(start, chunk)] = y.astype(o_ref.dtype)


def classifier_forward(x, w1, b1, w2, b2, *, block_b=4096, chunk=512,
                       mxu_dtype=None):
    """Forward pass matching Classifier.forward(x) with default flags.

    PyTorch-layout parameters:
      x : [B, F]
      w1: [H, F]   (fc1.weight)
      b1: [H]      (fc1.bias)
      w2: [H]      (fc2.weight[0, :])
      b2: scalar   (fc2.bias[0])
    Returns: [B]
    """
    B, F = x.shape
    H = w1.shape[0]

    # ---- batch-tile selection (the lane axis of the output) ----------------
    #  * multiple of 128 so (1, tm) output blocks are unmasked, lane-dense
    #  * large (up to block_b) so per-grid-step overhead is amortized
    #  * for B > 256, cap at ~ceil(B/2) so grid >= 2 (both v7x TCs get work)
    if B <= 256:
        tm = _round_up(max(B, 8), 128)                 # single tile
    else:
        tm = min(block_b, _round_up(-(-B // 2), 128))  # >= 2 tiles
    if tm <= chunk:
        chunk = tm
    else:
        tm = _round_up(tm, chunk)                      # chunk must divide tm

    # Only tiny batches (B < one tile) get padded (negligible, launch-bound);
    # large batches rely on Pallas partial-block handling -> no extra HBM copy.
    if B < tm:
        x = jnp.pad(x, ((0, tm - B), (0, 0)))
    n_rows = max(B, tm)
    grid = pl.cdiv(n_rows, tm)

    # Optional reduced-precision MXU path: cast in HBM (wrapper side) so DMA
    # bytes are halved too. Default off -> exact f32 numerics (pinned HIGHEST).
    if mxu_dtype is not None:
        x = x.astype(mxu_dtype)
        w1 = w1.astype(mxu_dtype)
        precision = None
    else:
        precision = lax.Precision.HIGHEST

    b1_2d = b1.astype(jnp.float32).reshape(H, 1)
    w2_2d = w2.astype(jnp.float32).reshape(H, 1)
    b2_2d = jnp.asarray(b2, jnp.float32).reshape(1, 1)

    kernel = functools.partial(_classifier_kernel, chunk=chunk,
                               precision=precision)

    out = pl.pallas_call(
        kernel,
        out_shape=jax.ShapeDtypeStruct((1, n_rows), jnp.float32),
        grid=(grid,),
        in_specs=[
            pl.BlockSpec((tm, F), lambda i: (i, 0)),    # x tile: pipelined over B
            pl.BlockSpec((H, F), lambda i: (0, 0)),     # w1: resident
            pl.BlockSpec((H, 1), lambda i: (0, 0)),     # b1: resident
            pl.BlockSpec((H, 1), lambda i: (0, 0)),     # w2: resident
            pl.BlockSpec(memory_space=pltpu.MemorySpace.SMEM),  # b2 scalar
        ],
        out_specs=pl.BlockSpec((1, tm), lambda i: (0, i)),      # lane-dense
        compiler_params=pltpu.CompilerParams(
            dimension_semantics=("parallel",),   # shard batch tiles across TCs
        ),
    )(x, w1, b1_2d, w2_2d, b2_2d)

    # .squeeze() in the PyTorch module + drop any padded / OOB lanes.
    return out[0, :B]


def init_params(key, num_features, hidden_dim):
    """nn.Linear-style U(-1/sqrt(fan_in), 1/sqrt(fan_in)) init, PyTorch layouts."""
    k1, k2, k3, k4 = jax.random.split(key, 4)
    bound1 = 1.0 / jnp.sqrt(num_features)
    bound2 = 1.0 / jnp.sqrt(hidden_dim)
    w1 = jax.random.uniform(k1, (hidden_dim, num_features), jnp.float32, -bound1, bound1)
    b1 = jax.random.uniform(k2, (hidden_dim,), jnp.float32, -bound1, bound1)
    w2 = jax.random.uniform(k3, (hidden_dim,), jnp.float32, -bound2, bound2)
    b2 = jax.random.uniform(k4, (), jnp.float32, -bound2, bound2)
    return w1, b1, w2, b2


def _reference(x, w1, b1, w2, b2):
    h = jnp.maximum(
        lax.dot_general(x, w1, (((1,), (1,)), ((), ())),
                        precision=lax.Precision.HIGHEST) + b1, 0.0)
    return h @ w2 + b2


if __name__ == "__main__":
    NUM_FEATURES, HIDDEN_DIM = 32, 32
    key = jax.random.PRNGKey(0)
    kp, kx1, kx2, kx3 = jax.random.split(key, 4)
    w1, b1, w2, b2 = init_params(kp, NUM_FEATURES, HIDDEN_DIM)

    # Case 1: tiny batch -> single (padded) 128-row tile, grid = 1.
    B = 8
    x = jax.random.normal(kx1, (B, NUM_FEATURES), jnp.float32)
    y = classifier_forward(x, w1, b1, w2, b2)
    jax.block_until_ready(y)
    assert y.shape == (B,)
    assert jnp.allclose(y, _reference(x, w1, b1, w2, b2), atol=1e-5, rtol=1e-5)

    # Case 2: B=300 -> two 256-row tiles, ragged last block, no jnp.pad.
    B2 = 300
    x2 = jax.random.normal(kx2, (B2, NUM_FEATURES), jnp.float32)
    y2 = classifier_forward(x2, w1, b1, w2, b2)
    jax.block_until_ready(y2)
    assert y2.shape == (B2,)
    assert jnp.allclose(y2, _reference(x2, w1, b1, w2, b2), atol=1e-5, rtol=1e-5)

    # Case 3: B=1300 -> two 1024-row tiles, 512-lane inner chunk loop,
    #         ragged last block, no jnp.pad.
    B3 = 1300
    x3 = jax.random.normal(kx3, (B3, NUM_FEATURES), jnp.float32)
    y3 = classifier_forward(x3, w1, b1, w2, b2)
    jax.block_until_ready(y3)
    assert y3.shape == (B3,)
    assert jnp.allclose(y3, _reference(x3, w1, b1, w2, b2), atol=1e-5, rtol=1e-5)

    print("KERNEL_OK")
</pallas_src>

<mosaic_0001>
module attributes {stable_mosaic.version = 11 : i64} {
  func.func @_classifier_kernel(%arg0: i32, %arg1: memref<128x32xf32, #tpu.memory_space<vmem>>, %arg2: memref<32x32xf32, #tpu.memory_space<vmem>>, %arg3: memref<32x1xf32, #tpu.memory_space<vmem>>, %arg4: memref<32x1xf32, #tpu.memory_space<vmem>>, %arg5: memref<1x1xf32, #tpu.memory_space<smem>>, %arg6: memref<1x128xf32, #tpu.memory_space<vmem>>) attributes {dimension_semantics = [#tpu.dimension_semantics<parallel>], iteration_bounds = array<i64: 1>, scalar_prefetch = 0 : i64, scratch_operands = 0 : i64, tpu.core_type = #tpu.core_type<tc>, window_params = [{transform_indices = @transform_0, window_bounds = array<i64: 128, 32>}, {pipeline_mode = #tpu.pipeline_mode<synchronous>, transform_indices = @transform_1, window_bounds = array<i64: 32, 32>}, {pipeline_mode = #tpu.pipeline_mode<synchronous>, transform_indices = @transform_2, window_bounds = array<i64: 32, 1>}, {pipeline_mode = #tpu.pipeline_mode<synchronous>, transform_indices = @transform_3, window_bounds = array<i64: 32, 1>}, {transform_indices = @transform_4, window_bounds = array<i64: 1, 1>}, {transform_indices = @transform_5, window_bounds = array<i64: 1, 128>}]} {
    %c0 = arith.constant 0 : index
    %c0_0 = arith.constant 0 : index
    %0 = vector.load %arg2[%c0, %c0_0] : memref<32x32xf32, #tpu.memory_space<vmem>>, vector<32x32xf32>
    %c0_1 = arith.constant 0 : index
    %c0_2 = arith.constant 0 : index
    %1 = vector.load %arg3[%c0_1, %c0_2] : memref<32x1xf32, #tpu.memory_space<vmem>>, vector<32x1xf32>
    %c0_3 = arith.constant 0 : index
    %c0_4 = arith.constant 0 : index
    %2 = vector.load %arg4[%c0_3, %c0_4] : memref<32x1xf32, #tpu.memory_space<vmem>>, vector<32x1xf32>
    %c0_5 = arith.constant 0 : index
    %c0_6 = arith.constant 0 : index
    %3 = memref.load %arg5[%c0_5, %c0_6] : memref<1x1xf32, #tpu.memory_space<smem>>
    %c0_7 = arith.constant 0 : index
    %c0_8 = arith.constant 0 : index
    %4 = vector.load %arg1[%c0_7, %c0_8] : memref<128x32xf32, #tpu.memory_space<vmem>>, vector<128x32xf32>
    %cst = arith.constant dense<0.000000e+00> : vector<32x128xf32>
    %5 = tpu.matmul %0, %4, %cst {dimension_numbers = #tpu.dot_dimension_numbers<[1], [1], [0], [0], [0, 0, 1, 0], [], []>, precision = #tpu.contract_precision<fp32>} : vector<32x32xf32>, vector<128x32xf32>, vector<32x128xf32> -> vector<32x128xf32>
    %6 = vector.broadcast %1 : vector<32x1xf32> to vector<32x128xf32>
    %7 = arith.addf %5, %6 : vector<32x128xf32>
    %cst_9 = arith.constant 0.000000e+00 : f32
    %8 = vector.broadcast %cst_9 : f32 to vector<32x128xf32>
    %9 = arith.maximumf %7, %8 : vector<32x128xf32>
    %10 = vector.broadcast %2 : vector<32x1xf32> to vector<32x128xf32>
    %11 = arith.mulf %9, %10 : vector<32x128xf32>
    %cst_10 = arith.constant dense<0.000000e+00> : vector<128xf32>
    %12 = vector.multi_reduction <add>, %11, %cst_10 [0] : vector<32x128xf32> to vector<128xf32>
    %13 = vector.shape_cast %12 : vector<128xf32> to vector<1x128xf32>
    %14 = vector.broadcast %3 : f32 to vector<1x128xf32>
    %15 = arith.addf %13, %14 : vector<1x128xf32>
    %c0_11 = arith.constant 0 : index
    %c0_12 = arith.constant 0 : index
    %16 = vector.load %arg6[%c0_11, %c0_12] : memref<1x128xf32, #tpu.memory_space<vmem>>, vector<1x128xf32>
    tpu.vector_store %arg6[%c0_11, %c0_12], %15 {strides = array<i32>} : memref<1x128xf32, #tpu.memory_space<vmem>>, vector<1x128xf32>,
    return
  }
  func.func @transform_0(%arg0: i32) -> (i32, i32) {
    %c0_i32 = arith.constant 0 : i32
    %c0_i32_0 = arith.constant 0 : i32
    return %arg0, %c0_i32 : i32, i32
  }
  func.func @transform_1(%arg0: i32) -> (i32, i32) {
    %c0_i32 = arith.constant 0 : i32
    %c0_i32_0 = arith.constant 0 : i32
    %c0_i32_1 = arith.constant 0 : i32
    return %c0_i32, %c0_i32_0 : i32, i32
  }
  func.func @transform_2(%arg0: i32) -> (i32, i32) {
    %c0_i32 = arith.constant 0 : i32
    %c0_i32_0 = arith.constant 0 : i32
    %c0_i32_1 = arith.constant 0 : i32
    return %c0_i32, %c0_i32_0 : i32, i32
  }
  func.func @transform_3(%arg0: i32) -> (i32, i32) {
    %c0_i32 = arith.constant 0 : i32
    %c0_i32_0 = arith.constant 0 : i32
    %c0_i32_1 = arith.constant 0 : i32
    return %c0_i32, %c0_i32_0 : i32, i32
  }
  func.func @transform_4(%arg0: i32) -> (i32, i32) {
    %c0_i32 = arith.constant 0 : i32
    %c0_i32_0 = arith.constant 0 : i32
    %c0_i32_1 = arith.constant 0 : i32
    return %c0_i32, %c0_i32_0 : i32, i32
  }
  func.func @transform_5(%arg0: i32) -> (i32, i32) {
    %c0_i32 = arith.constant 0 : i32
    %c0_i32_0 = arith.constant 0 : i32
    return %c0_i32, %arg0 : i32, i32
  }
}

</mosaic_0001>

<bundles_post_ra>
// kernel: tpu_custom_call.1
= control target key start
LH: loop header
LB: loop body
LE: loop exit
PB: predicated region body
PF: predicated region fallthrough
CT: control target
= control target key end

     0   :  { %vm71_vm0 = vcmask 261120   ;;  %s1852_s0 = inlined_call_operand.vmem [shape: f32[128,32], index: 0, kind: input, shape index: {}]   ;;  %s1853_s1 = inlined_call_operand.vmem [shape: f32[32,32], index: 1, kind: input, shape index: {}]   ;;  %s1854_s2 = inlined_call_operand.vmem [shape: f32[32,1], index: 2, kind: input, shape index: {}]   ;;  %s1855_s3 = inlined_call_operand.vmem [shape: f32[32,1], index: 3, kind: input, shape index: {}]   ;;  %s1856_s4 = inlined_call_operand.<no memory space> [shape: f32[1,1], index: 4, kind: input, shape index: {}]   ;;  %s1857_s5 = inlined_call_operand.hbm [shape: f32[1,128], index: 5, kind: output, shape index: {}]  }
   0x1   :  { %v50_v0 = vld [vmem:[%s1852_s0 + $0x78] sm:$0xff]  ;;  %v49_v1 = vld [vmem:[%s1852_s0 + $0x70] sm:$0xff]  ;;  %v48_v2 = vld [vmem:[%s1852_s0 + $0x68] sm:$0xff] }
   0x2   :  { %v130_v3 = vsel %vm71_vm0, %v50_v0, 0  ;;  %v127_v4 = vsel %vm71_vm0, %v49_v1, 0  ;;  %v124_v5 = vsel %vm71_vm0, %v48_v2, 0  ;;  %v47_v6 = vld [vmem:[%s1852_s0 + $0x60] sm:$0xff]  ;;  %v46_v7 = vld [vmem:[%s1852_s0 + $0x58] sm:$0xff]  ;;  %v45_v12 = vld [vmem:[%s1852_s0 + $0x50] sm:$0xff] }
   0x3   :  { %v1380_v8 = vand.u32 4294901760, %v130_v3  ;;  %v1382_v9 = vand.u32 4294901760, %v127_v4  ;;  %v1384_v10 = vand.u32 4294901760, %v124_v5  ;;  %v121_v11 = vsel %vm71_vm0, %v47_v6, 0  ;;  %v44_v24 = vld [vmem:[%s1852_s0 + $0x48] sm:$0xff] }
   0x4   :  { %v1390_v13 = vand.u32 4294901760, %v121_v11  ;;  %v118_v14 = vsel %vm71_vm0, %v46_v7, 0  ;;  %v115_v19 = vsel %vm71_vm0, %v45_v12, 0 }
   0x5   :  { %1076 = vmatprep.subr.mxu0 %v1380_v8  ;;  %v1395_v15 = vsub.f32 %v130_v3, %v1380_v8  ;;  %v1398_v16 = vsub.f32 %v127_v4, %v1382_v9  ;;  %v1401_v17 = vsub.f32 %v124_v5, %v1384_v10  ;;  %v1404_v18 = vand.u32 4294901760, %v118_v14 }
   0x6   :  { %1077 = vmatpush3.xpose.msra.mxu0 %v1380_v8  ;;  %v1418_v23 = vsub.f32 %v121_v11, %v1390_v13 }
   0x7   :  { %1078 = vmatprep.subr.mxu0 %v1382_v9  ;;  %v1409_v20 = vand.u32 4294901760, %v1395_v15  ;;  %v1412_v21 = vand.u32 4294901760, %v1398_v16  ;;  %v1415_v22 = vand.u32 4294901760, %v1401_v17 }
   0x8   :  { %11 = vsyncpa [#allocation4], 0  ;;  %v1428_v27 = vand.u32 4294901760, %v115_v19  ;;  %v112_v28 = vsel %vm71_vm0, %v44_v24, 0  ;;  %v1432_v29 = vsub.f32 %v118_v14, %v1404_v18  ;;  %v1438_v33 = vand.u32 4294901760, %v1418_v23  ;;  %v43_v34 = vld [vmem:[%s1852_s0 + $0x40] sm:$0xff] }
   0x9   :  { %v257_v25 = vsub.f32 %v1395_v15, %v1409_v20  ;;  %v264_v26 = vsub.f32 %v1398_v16, %v1412_v21  ;;  %v271_v32 = vsub.f32 %v1401_v17, %v1415_v22  ;;  %v1444_v35 = vand.u32 4294901760, %v112_v28  ;;  %v42_v41 = vld [vmem:[%s1852_s0 + $0x38] sm:$0xff]  ;;  %v22_v48 = vld [vmem:[%s1853_s1] sm:$0xff]  ;;  %v41_v49 = vld [vmem:[%s1852_s0 + $0x30] sm:$0xff]  ;;  %s1331_s22 = smov [#allocation3]  }
   0xa   :  { %1079 = vmatpush3.xpose.msra.mxu0 %v1382_v9  ;;  %v1447_v36 = vsub.f32 %v115_v19, %v1428_v27  ;;  %v278_v38 = vsub.f32 %v1418_v23, %v1438_v33  ;;  %v1453_v39 = vand.u32 4294901760, %v1432_v29  ;;  %v109_v40 = vsel %vm71_vm0, %v43_v34, 0  ;;  %v40_v57 = vld [vmem:[%s1852_s0 + $0x28] sm:$0xff]  ;;  %v39_v2 = vld [vmem:[%s1852_s0 + $0x20] sm:$0xff]  ;;  %v38_v24 = vld [vmem:[%s1852_s0 + $0x18] sm:$0xff]  ;;  %s948_s23 = sshll.u32 %s1331_s22, 4  ;;  %s949_s23 = int_to_ptr.vmem [resolvable:$true] %s948_s23 }
   0xb   :  { %1080 = vmatprep.subr.mxu0 %v1384_v10  ;;  %v258_v30 = vand.u32 4294901760, %v257_v25  ;;  %v265_v31 = vand.u32 4294901760, %v264_v26  ;;  %v272_v37 = vand.u32 4294901760, %v271_v32  ;;  %v1464_v43 = vsub.f32 %v112_v28, %v1444_v35  ;;  %v26_v11 = vld [vmem:[%s1854_s2] sm:$0xff]  ;;  %s1308_s24 = scalar_lea.vmem %s949_s23, 16  ;;  %s1312_s25 = scalar_lea.vmem %s949_s23, 32 }
   0xc   :  { %v1461_v42 = vand.u32 4294901760, %v1447_v36  ;;  %v279_v44 = vand.u32 4294901760, %v278_v38  ;;  %v285_v45 = vsub.f32 %v1432_v29, %v1453_v39  ;;  %v1469_v46 = vand.u32 4294901760, %v109_v40  ;;  %p1309_p0 = scmp.ne.s32.totalorder %s949_s23, %s1308_s24  ;;  %p1313_p1 = scmp.lt.s32.totalorder %s949_s23, %s949_s23 }
   0xd   :  { %1114 = vmatprep.subr.mxu1 %v258_v30  ;;  %v106_v47 = vsel %vm71_vm0, %v42_v41, 0  ;;  %v1484_v52 = vand.u32 4294901760, %v1464_v43  ;;  %v73_v53 = vsel %vm71_vm0, %v22_v48, 0  ;;  %v103_v55 = vsel %vm71_vm0, %v41_v49, 0  ;;  %p1314_p2 = scmp.lt.s32.totalorder %s1312_s25, %s1308_s24 }
   0xe   :  { %1081 = vmatpush3.xpose.msra.mxu0 %v1384_v10  ;;  %1115 = vmatpush3.xpose.msra.mxu1 %v258_v30  ;;  %v292_v50 = vsub.f32 %v1447_v36, %v1461_v42  ;;  %v1481_v51 = vand.u32 4294901760, %v106_v47  ;;  %v286_v54 = vand.u32 4294901760, %v285_v45  ;;  %v1490_v56 = vsub.f32 %v109_v40, %v1469_v46  ;;  %v37_v40 = vld [vmem:[%s1852_s0 + $0x10] sm:$0xff] }
   0xf   :  { %1082 = vmatprep.subr.mxu0 %v1390_v13  ;;  %1116 = vmatprep.subr.mxu1 %v265_v31  ;;  %v1495_v58 = vand.u32 4294901760, %v73_v53  ;;  %v1502_v61 = vand.u32 4294901760, %v103_v55  ;;  %v100_v62 = vsel %vm71_vm0, %v40_v57, 0  ;;  %v299_v63 = vsub.f32 %v1464_v43, %v1484_v52  ;;  %p1315_p3 = por %p1314_p2, %p1313_p1 }
  0x10   :  { %v293_v60 = vand.u32 4294901760, %v292_v50  ;;  %v1509_v0 = vand.u32 4294901760, %v1490_v56  ;;  %v1512_v1 = vsub.f32 %v106_v47, %v1481_v51  ;;  %v1522_v5 = vand.u32 4294901760, %v100_v62  ;;  %v36_v50 = vld [vmem:[%s1852_s0 + $0x8] sm:$0xff] }
  0x11   :  { %v1498_v59 = vsub.f32 %v73_v53, %v1495_v58  ;;  %1146 = vmatprep.mubr.f32.mxu1 %v1495_v58  ;;  %v97_v6 = vsel %vm71_vm0, %v39_v2, 0  ;;  %v1526_v7 = vsub.f32 %v103_v55, %v1502_v61  ;;  %v300_v12 = vand.u32 4294901760, %v299_v63  ;;  %v35_v63 = vld [vmem:[%s1852_s0] sm:$0xff]  ;;  %v23_v2 = vld [vmem:[%s1853_s1 + $0x8] sm:$0xff]  ;;  %p1316_p4 = pnand %p1315_p3, %p1309_p0 }
  0x12   :  { %1083 = vmatpush3.xpose.msra.mxu0 %v1390_v13  ;;  %1117 = vmatpush3.xpose.msra.mxu1 %v265_v31  ;;  %v306_v14 = vsub.f32 %v1490_v56, %v1509_v0  ;;  %v1535_v19 = vand.u32 4294901760, %v1512_v1  ;;  %v1330_v26 = vmov 0   ;;  %v1541_v28 = vand.u32 4294901760, %v97_v6  ;;  %v27_v31 = vld [vmem:[%s1854_s2 + $0x8] sm:$0xff] }
  0x13   :  { %1084 = vmatprep.subr.mxu0 %v1404_v18  ;;  %1118 = vmatprep.subr.mxu1 %v272_v37  ;;  %v1858_v3 = vand.u32 4294901760, %v1498_v59  ;;  %v94_v30 = vsel %vm71_vm0, %v38_v24, 0  ;;  %v1554_v38 = vsub.f32 %v100_v62, %v1522_v5 }
  0x14   :  { %1306 = vset.pattern.permute.xlu0 %v1330_v26  ;;  %1307 = vset.pattern.permute.xlu1 %v1330_v26  ;;  %v307_v32 = vand.u32 4294901760, %v306_v14  ;;  %v313_v34 = vsub.f32 %v1512_v1, %v1535_v19  ;;  %v1560_v41 = vand.u32 4294901760, %v94_v30  ;;  %v1570_v49 = vsub.f32 %v97_v6, %v1541_v28 }
  0x15   :  { %v216_v4 = vsub.f32 %v1498_v59, %v1858_v3  ;;  %53 = vperm.xlu0 %1306, %v26_v11   ;;  %v1567_v48 = vand.u32 4294901760, %v1554_v38  ;;  %v85_v6 = vsel %vm71_vm0, %v35_v63, 0  ;;  %v76_v11 = vsel %vm71_vm0, %v23_v2, 0 }
  0x16   :  { %1085 = vmatpush3.xpose.msra.mxu0 %v1404_v18  ;;  %1119 = vmatpush3.xpose.msra.mxu1 %v272_v37  ;;  %v1551_v37 = vand.u32 4294901760, %v1526_v7  ;;  %v314_v45 = vand.u32 4294901760, %v313_v34  ;;  %v1586_v62 = vsub.f32 %v94_v30, %v1560_v41  ;;  %v25_v30 = vld [vmem:[%s1853_s1 + $0x18] sm:$0xff]  ;;  %v1618_v34 = vand.u32 4294901760, %v85_v6 }
  0x17   :  { %1086 = vmatprep.subr.mxu0 %v1428_v27  ;;  %1120 = vmatprep.subr.mxu1 %v279_v44  ;;  %v217_v25 = vand.u32 4294901760, %v216_v4  ;;  %v327_v57 = vsub.f32 %v1554_v38, %v1567_v48 }
  0x18   :  { %v320_v47 = vsub.f32 %v1526_v7, %v1551_v37 }
  0x19   :  { %1108 = vmatprep.mubr.f32.mxu0 %v217_v25  ;;  %58 = vperm.xlu0 %1306, %v27_v31   ;;  %v328_v14 = vand.u32 4294901760, %v327_v57  ;;  %v1606_v25 = vand.u32 4294901760, %v1586_v62  ;;  %v1614_v31 = vand.u32 4294901760, %v76_v11 }
  0x1a   :  { %1087 = vmatpush3.xpose.msra.mxu0 %v1428_v27  ;;  %1121 = vmatpush3.xpose.msra.mxu1 %v279_v44  ;;  %v91_v44 = vsel %vm71_vm0, %v37_v40, 0  ;;  %v321_v55 = vand.u32 4294901760, %v320_v47  ;;  %v82_v40 = vsel %vm71_vm0, %v25_v30, 0 }
  0x1b   :  { %1088 = vmatprep.subr.mxu0 %v1444_v35  ;;  %1122 = vmatprep.subr.mxu1 %v286_v54  ;;  %v1576_v53 = vand.u32 4294901760, %v91_v44  ;;  %1869 = vst [vmem:[#allocation7_spill] sm:$0xff] %v1606_v25  ;;  %v1635_v63 = vand.u32 4294901760, %v82_v40 }
  0x1d   :  { %v1609_v26 = vsub.f32 %v91_v44, %v1576_v53 }
  0x1e   :  { %1089 = vmatpush3.xpose.msra.mxu0 %v1444_v35  ;;  %1123 = vmatpush3.xpose.msra.mxu1 %v286_v54  ;;  %v88_v54 = vsel %vm71_vm0, %v36_v50, 0 }
  0x1f   :  { %1090 = vmatprep.subr.mxu0 %v1469_v46  ;;  %1124 = vmatprep.subr.mxu1 %v293_v60  ;;  %v1595_v4 = vand.u32 4294901760, %v88_v54  ;;  %v1625_v47 = vand.u32 4294901760, %v1609_v26 }
  0x21   :  { %1870 = vst [vmem:[#allocation8_spill] sm:$0xff] %v1625_v47  ;;  %v1628_v50 = vsub.f32 %v88_v54, %v1595_v4 }
  0x22   :  { %1091 = vmatpush3.xpose.msra.mxu0 %v1469_v46  ;;  %1125 = vmatpush3.xpose.msra.mxu1 %v293_v60  ;;  %v1583_v60 = vand.u32 4294901760, %v1570_v49 }
  0x23   :  { %1092 = vmatprep.subr.mxu0 %v1481_v51  ;;  %1126 = vmatprep.subr.mxu1 %v300_v12  ;;  %v1642_v54 = vand.u32 4294901760, %v1628_v50 }
  0x24   :  { %1868 = vst [vmem:[#allocation6_spill] sm:$0xff] %v1583_v60  ;;  %v334_v24 = vsub.f32 %v1570_v49, %v1583_v60 }
  0x25   :  { %1871 = vst [vmem:[#allocation9_spill] sm:$0xff] %v1642_v54  ;;  %v355_v3 = vsub.f32 %v1628_v50, %v1642_v54 }
  0x26   :  { %1093 = vmatpush3.xpose.msra.mxu0 %v1481_v51  ;;  %1127 = vmatpush3.xpose.msra.mxu1 %v300_v12  ;;  %v24_v12 = vld [vmem:[%s1853_s1 + $0x10] sm:$0xff]  ;;  %v335_v44 = vand.u32 4294901760, %v334_v24  ;;  %v1645_v24 = vsub.f32 %v85_v6, %v1618_v34 }
  0x27   :  { %1094 = vmatprep.subr.mxu0 %v1502_v61  ;;  %1128 = vmatprep.subr.mxu1 %v307_v32 }
  0x28   :  { %v1659_v6 = vand.u32 4294901760, %v1645_v24 }
  0x2a   :  { %1095 = vmatpush3.xpose.msra.mxu0 %v1502_v61  ;;  %1129 = vmatpush3.xpose.msra.mxu1 %v307_v32  ;;  %v79_v32 = vsel %vm71_vm0, %v24_v12, 0  ;;  %v348_v12 = vsub.f32 %v1609_v26, %v1625_v47 }
  0x2b   :  { %1096 = vmatprep.subr.mxu0 %v1522_v5  ;;  %1130 = vmatprep.subr.mxu1 %v314_v45  ;;  %v1630_v57 = vand.u32 4294901760, %v79_v32 }
  0x2e   :  { %1097 = vmatpush3.xpose.msra.mxu0 %v1522_v5  ;;  %1131 = vmatpush3.xpose.msra.mxu1 %v314_v45  ;;  %v341_v45 = vsub.f32 %v1586_v62, %v1606_v25 }
  0x2f   :  { %1098 = vmatprep.subr.mxu0 %v1541_v28  ;;  %1132 = vmatprep.subr.mxu1 %v321_v55 }
  0x30   :  { %v342_v2 = vand.u32 4294901760, %v341_v45  ;;  %v349_v45 = vand.u32 4294901760, %v348_v12  ;;  %v362_v12 = vsub.f32 %v1645_v24, %v1659_v6 }
  0x32   :  { %1099 = vmatpush3.xpose.msra.mxu0 %v1541_v28  ;;  %1133 = vmatpush3.xpose.msra.mxu1 %v321_v55  ;;  %v1633_v55 = vsub.f32 %v76_v11, %v1614_v31  ;;  %v1648_v11 = vsub.f32 %v79_v32, %v1630_v57 }
  0x33   :  { %1100 = vmatprep.subr.mxu0 %v1560_v41  ;;  %1134 = vmatprep.subr.mxu1 %v328_v14 }
  0x34   :  { %v1865_v30 = vand.u32 4294901760, %v1633_v55  ;;  %v235_v32 = vand.u32 4294901760, %v1648_v11 }
  0x36   :  { %1101 = vmatpush3.xpose.msra.mxu0 %v1560_v41  ;;  %1135 = vmatpush3.xpose.msra.mxu1 %v328_v14  ;;  %v1652_v14 = vsub.f32 %v82_v40, %v1635_v63  ;;  %v226_v40 = vsub.f32 %v1633_v55, %v1865_v30  ;;  %v236_v54 = vsub.f32 %v1648_v11, %v235_v32 }
  0x37   :  { %1102 = vmatprep.subr.mxu0 %v1576_v53  ;;  %1136 = vmatprep.subr.mxu1 %v335_v44 }
  0x38   :  { %v245_v47 = vand.u32 4294901760, %v1652_v14  ;;  %v227_v25 = vand.u32 4294901760, %v226_v40  ;;  %v28_v40 = vld [vmem:[%s1854_s2 + $0x10] sm:$0xff] }
  0x39   :  { %63 = vperm.xlu1 %1307, %v28_v40  }
  0x3a   :  { %1103 = vmatpush3.xpose.msra.mxu0 %v1576_v53  ;;  %1137 = vmatpush3.xpose.msra.mxu1 %v335_v44  ;;  %v356_v44 = vand.u32 4294901760, %v355_v3  ;;  %v246_v30 = vsub.f32 %v1652_v14, %v245_v47  ;;  %v237_v3 = vand.u32 4294901760, %v236_v54 }
  0x3b   :  { %1104 = vmatprep.subr.mxu0 %v1595_v4  ;;  %1138 = vmatprep.subr.mxu1 %v342_v2 }
  0x3c   :  { %v247_v60 = vand.u32 4294901760, %v246_v30 }
  0x3e   :  { %1105 = vmatpush3.xpose.msra.mxu0 %v1595_v4  ;;  %1139 = vmatpush3.xpose.msra.mxu1 %v342_v2  ;;  %v363_v2 = vand.u32 4294901760, %v362_v12 }
  0x3f   :  { %1106 = vmatprep.subr.mxu0 %v1618_v34  ;;  %1140 = vmatprep.subr.mxu1 %v349_v45 }
  0x42   :  { %1107 = vmatpush3.xpose.msra.mxu0 %v1618_v34  ;;  %1141 = vmatpush3.xpose.msra.mxu1 %v349_v45 }
  0x43   :  { %1142 = vmatprep.subr.mxu1 %v356_v44  ;;  %1152 = vmatprep.subr.mxu0 %v1395_v15 }
  0x45   :  { %1109 = vmatmul.mubr.f32.vlgmr.msra.gmra.mxu0 %v227_v25  ;;  %v29_v25 = vld [vmem:[%s1854_s2 + $0x18] sm:$0xff] }
  0x46   :  { %1143 = vmatpush3.xpose.msra.mxu1 %v356_v44  ;;  %1153 = vmatpush3.xpose.msra.mxu0 %v1395_v15  ;;  %v30_v15 = vld [vmem:[%s1855_s3] sm:$0xff] }
  0x47   :  { %1144 = vmatprep.subr.mxu1 %v363_v2  ;;  %1154 = vmatprep.subr.mxu0 %v1398_v16 }
  0x48   :  { %1111 = vmatprep.mubr.f32.mxu0 %v237_v3  ;;  %68 = vperm.xlu1 %1307, %v29_v25  }
  0x49   :  { %1112 = vmatmul.mubr.f32.gmra.mxu0 %v247_v60  ;;  %908 = vperm.xlu0 %1306, %v30_v15   ;;  %v32_v60 = vld [vmem:[%s1855_s3 + $0x10] sm:$0xff] }
  0x4a   :  { %1145 = vmatpush3.xpose.msra.mxu1 %v363_v2  ;;  %1155 = vmatpush3.xpose.msra.mxu0 %v1398_v16  ;;  %v31_v16 = vld [vmem:[%s1855_s3 + $0x8] sm:$0xff] }
  0x4b   :  { %1156 = vmatprep.subr.mxu0 %v1401_v17  ;;  %1190 = vmatprep.subr.mxu1 %v1380_v8 }
  0x4c   :  { %1184 = vmatprep.mubr.f32.mxu0 %v1498_v59  ;;  %913 = vperm.xlu1 %1307, %v31_v16  }
  0x4d   :  { %1147 = vmatmul.mubr.f32.vlgmr.msra.gmra.mxu1 %v1614_v31  ;;  %918 = vperm.xlu0 %1306, %v32_v60  }
  0x4e   :  { %1157 = vmatpush3.xpose.msra.mxu0 %v1401_v17  ;;  %1191 = vmatpush3.xpose.msra.mxu1 %v1380_v8  ;;  %v1872_v17 = vand.u32 4294901760, %v1498_v59 }
  0x4f   :  { %1158 = vmatprep.subr.mxu0 %v1418_v23  ;;  %1192 = vmatprep.subr.mxu1 %v1382_v9 }
  0x50   :  { %1149 = vmatprep.mubr.f32.mxu1 %v1630_v57 }
  0x51   :  { %1150 = vmatmul.mubr.f32.gmra.mxu1 %v1635_v63 }
  0x52   :  { %1159 = vmatpush3.xpose.msra.mxu0 %v1418_v23  ;;  %1193 = vmatpush3.xpose.msra.mxu1 %v1382_v9  ;;  %v33_v23 = vld [vmem:[%s1855_s3 + $0x18] sm:$0xff] }
  0x53   :  { %1160 = vmatprep.subr.mxu0 %v1432_v29  ;;  %1194 = vmatprep.subr.mxu1 %v1384_v10 }
  0x54   :  { %1222 = vmatprep.mubr.f32.mxu1 %v1872_v17  ;;  %923 = vperm.xlu1 %1307, %v33_v23  }
  0x56   :  { %1161 = vmatpush3.xpose.msra.mxu0 %v1432_v29  ;;  %1195 = vmatpush3.xpose.msra.mxu1 %v1384_v10 }
  0x57   :  { %1162 = vmatprep.subr.mxu0 %v1447_v36  ;;  %1196 = vmatprep.subr.mxu1 %v1390_v13 }
  0x5a   :  { %1163 = vmatpush3.xpose.msra.mxu0 %v1447_v36  ;;  %1197 = vmatpush3.xpose.msra.mxu1 %v1390_v13 }
  0x5b   :  { %1164 = vmatprep.subr.mxu0 %v1464_v43  ;;  %1198 = vmatprep.subr.mxu1 %v1404_v18 }
  0x5e   :  { %1165 = vmatpush3.xpose.msra.mxu0 %v1464_v43  ;;  %1199 = vmatpush3.xpose.msra.mxu1 %v1404_v18 }
  0x5f   :  { %1166 = vmatprep.subr.mxu0 %v1490_v56  ;;  %1200 = vmatprep.subr.mxu1 %v1428_v27 }
  0x62   :  { %1167 = vmatpush3.xpose.msra.mxu0 %v1490_v56  ;;  %1201 = vmatpush3.xpose.msra.mxu1 %v1428_v27 }
  0x63   :  { %1168 = vmatprep.subr.mxu0 %v1512_v1  ;;  %1202 = vmatprep.subr.mxu1 %v1444_v35 }
  0x66   :  { %1169 = vmatpush3.xpose.msra.mxu0 %v1512_v1  ;;  %1203 = vmatpush3.xpose.msra.mxu1 %v1444_v35 }
  0x67   :  { %1170 = vmatprep.subr.mxu0 %v1526_v7  ;;  %1204 = vmatprep.subr.mxu1 %v1469_v46 }
  0x6a   :  { %1171 = vmatpush3.xpose.msra.mxu0 %v1526_v7  ;;  %1205 = vmatpush3.xpose.msra.mxu1 %v1469_v46 }
  0x6b   :  { %1172 = vmatprep.subr.mxu0 %v1554_v38  ;;  %1206 = vmatprep.subr.mxu1 %v1481_v51 }
  0x6e   :  { %1173 = vmatpush3.xpose.msra.mxu0 %v1554_v38  ;;  %1207 = vmatpush3.xpose.msra.mxu1 %v1481_v51 }
  0x6f   :  { %1174 = vmatprep.subr.mxu0 %v1570_v49  ;;  %1208 = vmatprep.subr.mxu1 %v1502_v61 }
  0x72   :  { %1175 = vmatpush3.xpose.msra.mxu0 %v1570_v49  ;;  %1209 = vmatpush3.xpose.msra.mxu1 %v1502_v61 }
  0x73   :  { %1176 = vmatprep.subr.mxu0 %v1586_v62  ;;  %1210 = vmatprep.subr.mxu1 %v1522_v5 }
  0x76   :  { %1177 = vmatpush3.xpose.msra.mxu0 %v1586_v62  ;;  %1211 = vmatpush3.xpose.msra.mxu1 %v1522_v5 }
  0x77   :  { %1178 = vmatprep.subr.mxu0 %v1609_v26  ;;  %1212 = vmatprep.subr.mxu1 %v1541_v28 }
  0x7a   :  { %1179 = vmatpush3.xpose.msra.mxu0 %v1609_v26  ;;  %1213 = vmatpush3.xpose.msra.mxu1 %v1541_v28 }
  0x7b   :  { %1180 = vmatprep.subr.mxu0 %v1628_v50  ;;  %1214 = vmatprep.subr.mxu1 %v1560_v41 }
  0x7e   :  { %1181 = vmatpush3.xpose.msra.mxu0 %v1628_v50  ;;  %1215 = vmatpush3.xpose.msra.mxu1 %v1560_v41 }
  0x7f   :  { %1182 = vmatprep.subr.mxu0 %v1645_v24  ;;  %1216 = vmatprep.subr.mxu1 %v1576_v53 }
  0x82   :  { %1183 = vmatpush3.xpose.msra.mxu0 %v1645_v24  ;;  %1217 = vmatpush3.xpose.msra.mxu1 %v1576_v53 }
  0x83   :  { %1218 = vmatprep.subr.mxu1 %v1595_v4  ;;  %1228 = vmatprep.subr.mxu0 %v1409_v20 }
  0x85   :  { %1185 = vmatmul.mubr.f32.vlgmr.msra.gmra.mxu0 %v1633_v55 }
  0x86   :  { %1219 = vmatpush3.xpose.msra.mxu1 %v1595_v4  ;;  %1229 = vmatpush3.xpose.msra.mxu0 %v1409_v20  ;;  %v1873_v20 = vand.u32 4294901760, %v1633_v55 }
  0x87   :  { %1187 = vmatprep.mubr.f32.mxu0 %v1648_v11  ;;  %1220 = vmatprep.subr.mxu1 %v1618_v34 }
  0x88   :  { %1230 = vmatprep.subr.mxu0 %v1412_v21 }
  0x89   :  { %1188 = vmatmul.mubr.f32.gmra.mxu0 %v1652_v14 }
  0x8a   :  { %1221 = vmatpush3.xpose.msra.mxu1 %v1618_v34  ;;  %1231 = vmatpush3.xpose.msra.mxu0 %v1412_v21 }
  0x8b   :  { %1232 = vmatprep.subr.mxu0 %v1415_v22  ;;  %1266 = vmatprep.subr.mxu1 %v1380_v8 }
  0x8c   :  { %1260 = vmatprep.mubr.f32.mxu0 %v1495_v58 }
  0x8d   :  { %1223 = vmatmul.mubr.f32.vlgmr.msra.gmra.mxu1 %v1873_v20 }
  0x8e   :  { %1233 = vmatpush3.xpose.msra.mxu0 %v1415_v22  ;;  %1267 = vmatpush3.xpose.msra.mxu1 %v1380_v8  ;;  %v1874_v8 = vld [vmem:[#allocation6_spill] sm:$0xff] }
  0x8f   :  { %1225 = vmatprep.mubr.f32.mxu1 %v235_v32  ;;  %1234 = vmatprep.subr.mxu0 %v1438_v33 }
  0x90   :  { %1268 = vmatprep.subr.mxu1 %v1382_v9 }
  0x91   :  { %1226 = vmatmul.mubr.f32.gmra.mxu1 %v245_v47 }
  0x92   :  { %1235 = vmatpush3.xpose.msra.mxu0 %v1438_v33  ;;  %1269 = vmatpush3.xpose.msra.mxu1 %v1382_v9  ;;  %v1875_v9 = vld [vmem:[#allocation7_spill] sm:$0xff] }
  0x93   :  { %1236 = vmatprep.subr.mxu0 %v1453_v39  ;;  %1270 = vmatprep.subr.mxu1 %v1384_v10 }
  0x94   :  { %1298 = vmatprep.mubr.f32.mxu1 %v1495_v58 }
  0x96   :  { %1237 = vmatpush3.xpose.msra.mxu0 %v1453_v39  ;;  %1271 = vmatpush3.xpose.msra.mxu1 %v1384_v10  ;;  %v1876_v10 = vld [vmem:[#allocation8_spill] sm:$0xff]  ;;  %v54_v39 = vpop.permute.xlu0 %53 }
  0x97   :  { %1238 = vmatprep.subr.mxu0 %v1461_v42  ;;  %1272 = vmatprep.subr.mxu1 %v1390_v13 }
  0x9a   :  { %1239 = vmatpush3.xpose.msra.mxu0 %v1461_v42  ;;  %1273 = vmatpush3.xpose.msra.mxu1 %v1390_v13  ;;  %v1877_v13 = vld [vmem:[#allocation9_spill] sm:$0xff] }
  0x9b   :  { %1240 = vmatprep.subr.mxu0 %v1484_v52  ;;  %1274 = vmatprep.subr.mxu1 %v1404_v18 }
  0x9e   :  { %1241 = vmatpush3.xpose.msra.mxu0 %v1484_v52  ;;  %1275 = vmatpush3.xpose.msra.mxu1 %v1404_v18 }
  0x9f   :  { %1242 = vmatprep.subr.mxu0 %v1509_v0  ;;  %1276 = vmatprep.subr.mxu1 %v1428_v27 }
  0xa2   :  { %1243 = vmatpush3.xpose.msra.mxu0 %v1509_v0  ;;  %1277 = vmatpush3.xpose.msra.mxu1 %v1428_v27 }
  0xa3   :  { %1244 = vmatprep.subr.mxu0 %v1535_v19  ;;  %1278 = vmatprep.subr.mxu1 %v1444_v35 }
  0xa6   :  { %1245 = vmatpush3.xpose.msra.mxu0 %v1535_v19  ;;  %1279 = vmatpush3.xpose.msra.mxu1 %v1444_v35 }
  0xa7   :  { %1246 = vmatprep.subr.mxu0 %v1551_v37  ;;  %1280 = vmatprep.subr.mxu1 %v1469_v46 }
  0xaa   :  { %1247 = vmatpush3.xpose.msra.mxu0 %v1551_v37  ;;  %1281 = vmatpush3.xpose.msra.mxu1 %v1469_v46 }
  0xab   :  { %1248 = vmatprep.subr.mxu0 %v1567_v48  ;;  %1282 = vmatprep.subr.mxu1 %v1481_v51 }
  0xae   :  { %1249 = vmatpush3.xpose.msra.mxu0 %v1567_v48  ;;  %1283 = vmatpush3.xpose.msra.mxu1 %v1481_v51  ;;  %v59_v51 = vpop.permute.xlu0 %58 }
  0xaf   :  { %1250 = vmatprep.subr.mxu0 %v1874_v8  ;;  %1284 = vmatprep.subr.mxu1 %v1502_v61 }
  0xb2   :  { %1251 = vmatpush3.xpose.msra.mxu0 %v1874_v8  ;;  %1285 = vmatpush3.xpose.msra.mxu1 %v1502_v61 }
  0xb3   :  { %1252 = vmatprep.subr.mxu0 %v1875_v9  ;;  %1286 = vmatprep.subr.mxu1 %v1522_v5 }
  0xb4   :  { %v64_v42 = vpop.permute.xlu1 %63 }
  0xb6   :  { %1253 = vmatpush3.xpose.msra.mxu0 %v1875_v9  ;;  %1287 = vmatpush3.xpose.msra.mxu1 %v1522_v5 }
  0xb7   :  { %1254 = vmatprep.subr.mxu0 %v1876_v10  ;;  %1288 = vmatprep.subr.mxu1 %v1541_v28 }
  0xba   :  { %1255 = vmatpush3.xpose.msra.mxu0 %v1876_v10  ;;  %1289 = vmatpush3.xpose.msra.mxu1 %v1541_v28 }
  0xbb   :  { %1256 = vmatprep.subr.mxu0 %v1877_v13  ;;  %1290 = vmatprep.subr.mxu1 %v1560_v41 }
  0xbe   :  { %1257 = vmatpush3.xpose.msra.mxu0 %v1877_v13  ;;  %1291 = vmatpush3.xpose.msra.mxu1 %v1560_v41 }
  0xbf   :  { %1258 = vmatprep.subr.mxu0 %v1659_v6  ;;  %1292 = vmatprep.subr.mxu1 %v1576_v53 }
  0xc2   :  { %1259 = vmatpush3.xpose.msra.mxu0 %v1659_v6  ;;  %1293 = vmatpush3.xpose.msra.mxu1 %v1576_v53 }
  0xc3   :  { %1294 = vmatprep.subr.mxu1 %v1595_v4  ;;  %v69_v58 = vpop.permute.xlu1 %68 }
  0xc4   :  { %v909_v32 = vpop.permute.xlu0 %908 }
  0xc5   :  { %1261 = vmatmul.mubr.f32.vlgmr.msra.gmra.mxu0 %v1614_v31 }
  0xc6   :  { %1295 = vmatpush3.xpose.msra.mxu1 %v1595_v4  ;;  %1263 = vmatprep.mubr.f32.mxu0 %v1630_v57 }
  0xc7   :  { %1296 = vmatprep.subr.mxu1 %v1618_v34  ;;  %v914_v25 = vpop.permute.xlu1 %913 }
  0xc8   :  { %v919_v8 = vpop.permute.xlu0 %918 }
  0xc9   :  { %1264 = vmatmul.mubr.f32.gmra.mxu0 %v1635_v63 }
  0xca   :  { %1297 = vmatpush3.xpose.msra.mxu1 %v1618_v34 }
  0xcd   :  { %1299 = vmatmul.mubr.f32.vlgmr.msra.gmra.mxu1 %v1614_v31 }
  0xce   :  { %1301 = vmatprep.mubr.f32.mxu1 %v1630_v57 }
  0xcf   :  { %v924_v13 = vpop.permute.xlu1 %923 }
  0xd1   :  { %1302 = vmatmul.mubr.f32.gmra.mxu1 %v1635_v63 }
 0x105   :  { %v1110_v18 = vpop.f32.mrf.mxu0 }
 0x106   :  { %v230_v59 = vadd.f32 %v1110_v18, %v59_v51 }
 0x107   :  { %v219_v21 = vpop.f32.mrf.mxu0 }
 0x108   :  { %v220_v1 = vadd.f32 %v219_v21, %v54_v39  ;;  %v939_v39 = vstv %s1856_s4 }
 0x109   :  { %v1113_v22 = vpop.f32.mrf.mxu0 }
 0x10a   :  { %v250_v5 = vadd.f32 %v1113_v22, %v69_v58 }
 0x10b   :  { %v239_v29 = vpop.f32.mrf.mxu0 }
 0x10c   :  { %v240_v28 = vadd.f32 %v239_v29, %v64_v42 }
 0x10d   :  { %v1148_v27 = vpop.f32.mrf.mxu1 }
 0x10e   :  { %v407_v19 = vadd.f32 %v1148_v27, %v230_v59 }
 0x10f   :  { %v400_v33 = vpop.f32.mrf.mxu1 }
 0x110   :  { %v401_v41 = vadd.f32 %v400_v33, %v220_v1 }
 0x111   :  { %v1151_v36 = vpop.f32.mrf.mxu1 }
 0x112   :  { %v419_v49 = vadd.f32 %v1151_v36, %v250_v5 }
 0x113   :  { %v412_v46 = vpop.f32.mrf.mxu1 }
 0x114   :  { %v413_v62 = vadd.f32 %v412_v46, %v240_v28 }
 0x145   :  { %v1186_v35 = vpop.f32.mrf.mxu0 }
 0x146   :  { %v530_v48 = vadd.f32 %v1186_v35, %v407_v19 }
 0x147   :  { %v522_v43 = vpop.f32.mrf.mxu0 }
 0x148   :  { %v523_v53 = vadd.f32 %v522_v43, %v401_v41 }
 0x149   :  { %v1189_v52 = vpop.f32.mrf.mxu0 }
 0x14a   :  { %v544_v34 = vadd.f32 %v1189_v52, %v419_v49 }
 0x14b   :  { %v536_v61 = vpop.f32.mrf.mxu0 }
 0x14c   :  { %v537_v55 = vadd.f32 %v536_v61, %v413_v62 }
 0x14d   :  { %v1224_v56 = vpop.f32.mrf.mxu1 }
 0x14e   :  { %v641_v4 = vadd.f32 %v1224_v56, %v530_v48 }
 0x14f   :  { %v632_v0 = vpop.f32.mrf.mxu1 }
 0x150   :  { %v633_v47 = vadd.f32 %v632_v0, %v523_v53 }
 0x151   :  { %v1227_v37 = vpop.f32.mrf.mxu1 }
 0x152   :  { %v657_v63 = vadd.f32 %v1227_v37, %v544_v34 }
 0x153   :  { %v648_v26 = vpop.f32.mrf.mxu1 }
 0x154   :  { %v649_v14 = vadd.f32 %v648_v26, %v537_v55 }
 0x185   :  { %v1262_v7 = vpop.f32.mrf.mxu0 }
 0x186   :  { %v782_v50 = vadd.f32 %v1262_v7, %v641_v4 }
 0x187   :  { %v775_v38 = vpop.f32.mrf.mxu0 }
 0x188   :  { %v776_v54 = vadd.f32 %v775_v38, %v633_v47 }
 0x189   :  { %v1265_v31 = vpop.f32.mrf.mxu0 }
 0x18a   :  { %v794_v45 = vadd.f32 %v1265_v31, %v657_v63 }
 0x18b   :  { %v787_v11 = vpop.f32.mrf.mxu0 }
 0x18c   :  { %v788_v12 = vadd.f32 %v787_v11, %v649_v14 }
 0x18d   :  { %v1300_v57 = vpop.f32.mrf.mxu1 }
 0x18e   :  { %v887_v24 = vadd.f32 %v1300_v57, %v782_v50 }
 0x18f   :  { %v880_v30 = vpop.f32.mrf.mxu1 }
 0x190   :  { %v881_v6 = vadd.f32 %v880_v30, %v776_v54  ;;  %v903_v2 = vmax.f32 %v887_v24, 0.0 }
 0x191   :  { %v1303_v44 = vpop.f32.mrf.mxu1 }
 0x192   :  { %v902_v3 = vmax.f32 %v881_v6, 0.0  ;;  %v899_v40 = vadd.f32 %v1303_v44, %v794_v45  ;;  %v927_v60 = vmul.f32 %v914_v25, %v903_v2 }
 0x193   :  { %v892_v15 = vpop.f32.mrf.mxu1 }
 0x194   :  { %v926_v16 = vmul.f32 %v909_v32, %v902_v3  ;;  %v893_v17 = vadd.f32 %v892_v15, %v788_v12  ;;  %v905_v23 = vmax.f32 %v899_v40, 0.0 }
 0x196   :  { %v904_v20 = vmax.f32 %v893_v17, 0.0  ;;  %v930_v9 = vadd.f32 %v927_v60, %v926_v16  ;;  %v929_v18 = vmul.f32 %v924_v13, %v905_v23 }
 0x198   :  { %v928_v10 = vmul.f32 %v919_v8, %v904_v20 }
 0x19a   :  { %v931_v21 = vadd.f32 %v930_v9, %v928_v10 }
 0x19c   :  { %v932_v22 = vadd.f32 %v931_v21, %v929_v18 }
 0x19e   :  { %v933_v27 = vrot.slane %v932_v22, 4 }
 0x1a0   :  { %v934_v29 = vadd.f32 %v933_v27, %v932_v22 }
 0x1a2   :  { %v935_v33 = vrot.slane %v934_v29, 2 }
 0x1a4   :  { %v936_v35 = vadd.f32 %v935_v33, %v934_v29 }
 0x1a6   :  { %v937_v36 = vrot.slane %v936_v35, 1 }
 0x1a8   :  { %v938_v42 = vadd.f32 %v937_v36, %v936_v35 }
 0x1aa   :  { %v940_v43 = vadd.f32 %v939_v39, %v938_v42 }
 0x1ac   :  { %941 = vst [vmem:[#allocation3] sm:$0x1] %v940_v43 }
 0x1ad   :  { %1319 = shalt.err (!%p1316_p4)
}
 0x1ae   :  { %951 = dma.vmem_to_hbm [thread:$0]  %s949_s23, 16, %s1857_s5, [#allocation4]  }
 0x1af   :  { %1328 = dma.done.wait [#allocation4], 16  }
 0x1b0   :  { %1329 = vsyncadd [#allocation4], 4294967280 }
 0x1b1   :  { %955 = vsyncpa [#allocation4], 1 }

</bundles_post_ra>
